<compile_context>
chip_gen: v7x
topology: tpu7x:2x2x1
jax: 0.10.0
libtpu: 0.0.40
codegen_flags: <defaults>
</compile_context>

<pallas_src>
import jax
import jax.numpy as jnp
from jax.experimental import pallas as pl
from jax.experimental.pallas import tpu as pltpu


def _pick_tile_l(N, L, L2, c_in, c_out, x_item, out_item, mxu_item,
                 budget_bytes=18 * 1024 * 1024, cap=512):
    """Pick (tile_l, block_in_cols, vmem_estimate) for the length axis."""

    def need(t, b):
        return (2 * c_in * b * x_item               # x block, double-buffered
                + 2 * c_out * t * out_item          # out block, double-buffered
                + 2 * b * t * mxu_item              # pooling matrix, double-buffered
                + 2 * c_out * c_in * mxu_item       # conv weight, double-buffered
                + c_in * b * (4 + mxu_item)         # h (f32) + mxu-dtype copy
                + c_out * b * (4 + mxu_item)        # full-length conv result + cast
                + c_out * t * 4                     # pooled f32 before store
                + (c_in + c_out) * 8)               # scale/shift/bias (tiny)

    cands = []
    if L2 <= cap:
        if N == 1 and L2 >= 256:
            # Keep >=2 grid steps so v7x's two TensorCores / the pipeline have work.
            half = (L2 + 1) // 2
            t = 128 * ((half + 127) // 128)
            cands.append((t, 2 * t))
        cands.append((L2, L))                       # single full block along length
    top = min(cap, (L2 // 128) * 128)
    cands += [(t, 2 * t) for t in range(top, 127, -128)]
    if not cands:
        cands = [(L2, L)]

    for t, b in cands:
        if need(t, b) <= budget_bytes:
            return t, b, need(t, b)
    t, b = cands[-1]
    return t, b, need(t, b)


def transition_layer(x, gamma, beta, running_mean, running_var, conv_w, conv_b,
                     eps=1e-5,
                     mxu_dtype=jnp.bfloat16,     # MXU operand dtype (accumulate is f32)
                     ew_dtype=jnp.float32,       # BN/ReLU elementwise dtype (bf16 ok on v6e/v7x)
                     out_dtype=jnp.float32):
    """x: (N, C_in, L) PyTorch NCL layout.  Returns (N, C_out, L // 2)."""
    N, C_in, L = x.shape
    assert L >= 2, "AvgPool1d(2,2) needs L >= 2"
    L2 = L // 2                                   # odd L: last position dropped (AvgPool1d)
    C_out = conv_w.shape[0]

    # Fold BatchNorm1d (running stats) and the AvgPool 0.5 factor into per-channel scale/shift.
    inv_std = jax.lax.rsqrt(running_var.astype(jnp.float32) + eps)
    g32 = gamma.astype(jnp.float32)
    scale = (0.5 * g32 * inv_std).reshape(C_in, 1).astype(ew_dtype)
    shift = (0.5 * (beta.astype(jnp.float32)
                    - running_mean.astype(jnp.float32) * g32 * inv_std)
             ).reshape(C_in, 1).astype(ew_dtype)
    w = conv_w.reshape(C_out, C_in).astype(mxu_dtype)
    b = conv_b.reshape(C_out, 1).astype(jnp.float32)

    tile_l, bcols, vmem_need = _pick_tile_l(
        N, L, L2, C_in, C_out,
        jnp.dtype(x.dtype).itemsize, jnp.dtype(out_dtype).itemsize,
        jnp.dtype(mxu_dtype).itemsize)
    n_l = pl.cdiv(L2, tile_l)
    needs_mask = (L % bcols) != 0                 # last x block has unloaded (garbage) columns
    conv_first = C_out <= C_in                    # cheaper matmul order (transition halves C)

    # Pair-sum / compaction matrix: P[2k, k] = P[2k+1, k] = 1 (last odd row, if any, is zero).
    rows = jnp.arange(bcols, dtype=jnp.int32)[:, None]
    cols = jnp.arange(tile_l, dtype=jnp.int32)[None, :]
    pool_mat = ((rows // 2) == cols).astype(mxu_dtype)     # (bcols, tile_l)

    def kernel(x_ref, scale_ref, shift_ref, w_ref, p_ref, b_ref, o_ref):
        xb = x_ref[0].astype(ew_dtype)            # (C_in, bcols), contiguous NCL block
        # BN + ReLU; the 0.5 pool factor is folded into scale/shift (ReLU is pos. homogeneous).
        h = jnp.maximum(xb * scale_ref[...] + shift_ref[...], 0.0)
        if needs_mask:
            # Zero columns past the end of x so stale-VMEM NaN/Inf can't leak through the
            # pooling matmul (0 * NaN = NaN would poison every output column).
            j = pl.program_id(1)
            valid = L - j * bcols
            col = jax.lax.broadcasted_iota(jnp.int32, (1, bcols), 1)
            h = jnp.where(col < valid, h, 0.0)
        h = h.astype(mxu_dtype)
        if conv_first:
            # 1x1 conv (channel matmul) on full-length block, then pair-sum via P.
            y = jnp.dot(w_ref[...], h, preferred_element_type=jnp.float32)      # (C_out, bcols)
            y = jnp.dot(y.astype(mxu_dtype), p_ref[...],
                        preferred_element_type=jnp.float32)                     # (C_out, tile_l)
        else:
            hp = jnp.dot(h, p_ref[...], preferred_element_type=jnp.float32)     # (C_in, tile_l)
            y = jnp.dot(w_ref[...], hp.astype(mxu_dtype),
                        preferred_element_type=jnp.float32)                     # (C_out, tile_l)
        o_ref[0] = (y + b_ref[...]).astype(o_ref.dtype)

    vmem_limit = int(min(64 * 1024 * 1024,
                         max(32 * 1024 * 1024, vmem_need * 3 // 2 + (4 << 20))))

    return pl.pallas_call(
        kernel,
        out_shape=jax.ShapeDtypeStruct((N, C_out, L2), out_dtype),
        grid=(N, n_l),
        in_specs=[
            pl.BlockSpec((1, C_in, bcols), lambda n, j: (n, 0, j)),   # x (read once, contiguous)
            pl.BlockSpec((C_in, 1), lambda n, j: (0, 0)),             # scale (resident)
            pl.BlockSpec((C_in, 1), lambda n, j: (0, 0)),             # shift (resident)
            pl.BlockSpec((C_out, C_in), lambda n, j: (0, 0)),         # conv weight (resident)
            pl.BlockSpec((bcols, tile_l), lambda n, j: (0, 0)),       # pooling matrix (resident)
            pl.BlockSpec((C_out, 1), lambda n, j: (0, 0)),            # conv bias (resident)
        ],
        out_specs=pl.BlockSpec((1, C_out, tile_l), lambda n, j: (n, 0, j)),
        compiler_params=pltpu.CompilerParams(
            dimension_semantics=("parallel", "parallel"),
            vmem_limit_bytes=vmem_limit),
    )(x, scale, shift, w, pool_mat, b)


def _reference(x, gamma, beta, running_mean, running_var, conv_w, conv_b, eps=1e-5):
    # Pure-JAX reference following the PyTorch op order exactly (eval mode).
    x = x.astype(jnp.float32)
    xn = (x - running_mean[None, :, None]) * jax.lax.rsqrt(running_var[None, :, None] + eps)
    xn = xn * gamma[None, :, None] + beta[None, :, None]
    h = jnp.maximum(xn, 0.0)
    y = jnp.einsum('ncl,oc->nol', h, conv_w[:, :, 0].astype(jnp.float32)) \
        + conv_b[None, :, None].astype(jnp.float32)
    n, o, l = y.shape
    l2 = l // 2
    return y[:, :, :2 * l2].reshape(n, o, l2, 2).mean(-1)


def _make_inputs(key, N, C_in, C_out, L):
    k = jax.random.split(key, 7)
    x = jax.random.normal(k[0], (N, C_in, L), dtype=jnp.float32)
    gamma = jax.random.normal(k[1], (C_in,), dtype=jnp.float32) * 0.1 + 1.0
    beta = jax.random.normal(k[2], (C_in,), dtype=jnp.float32) * 0.1
    running_mean = jax.random.normal(k[3], (C_in,), dtype=jnp.float32) * 0.1
    running_var = jnp.abs(jax.random.normal(k[4], (C_in,), dtype=jnp.float32)) * 0.1 + 1.0
    conv_w = jax.random.normal(k[5], (C_out, C_in, 1), dtype=jnp.float32) * 0.1
    conv_b = jax.random.normal(k[6], (C_out,), dtype=jnp.float32) * 0.1
    return x, gamma, beta, running_mean, running_var, conv_w, conv_b


if __name__ == "__main__":
    key = jax.random.PRNGKey(0)
    k1, k2, k3, k4 = jax.random.split(key, 4)

    # Case 1: small shapes (batch=2, C_in=4, C_out=8, L=16), f32 MXU path, tight tolerance.
    N, C_in, C_out, L = 2, 4, 8, 16
    args = _make_inputs(k1, N, C_in, C_out, L)
    ref = _reference(*args)
    out = jax.block_until_ready(transition_layer(*args, mxu_dtype=jnp.float32))
    assert out.shape == (N, C_out, L // 2)
    assert jnp.allclose(out, ref, atol=1e-4, rtol=1e-4)

    # Case 2: same shapes, default bf16 MXU operands (f32 accumulate), loose tolerance.
    out_bf = jax.block_until_ready(transition_layer(*args))
    assert out_bf.shape == (N, C_out, L // 2)
    assert jnp.allclose(out_bf, ref, atol=3e-2, rtol=3e-2)

    # Case 3: odd L (last position dropped by AvgPool1d) and non-aligned channel counts.
    args3 = _make_inputs(k2, 1, 12, 20, 51)
    ref3 = _reference(*args3)
    out3 = jax.block_until_ready(transition_layer(*args3, mxu_dtype=jnp.float32))
    assert out3.shape == (1, 20, 25)
    assert jnp.allclose(out3, ref3, atol=1e-4, rtol=1e-4)

    # Case 4: N=1 length-split heuristic + partial last tile (pad-column masking path).
    args4 = _make_inputs(k3, 1, 6, 10, 700)
    ref4 = _reference(*args4)
    out4 = jax.block_until_ready(transition_layer(*args4, mxu_dtype=jnp.float32))
    assert out4.shape == (1, 10, 350)
    assert jnp.allclose(out4, ref4, atol=1e-4, rtol=1e-4)

    # Case 5: bf16 everywhere (bf16 x storage, bf16 BN/ReLU VALU, bf16 MXU) - v6e/v7x knob.
    args5 = _make_inputs(k4, N, C_in, C_out, L)
    ref5 = _reference(*args5)
    x5 = args5[0].astype(jnp.bfloat16)
    out5 = jax.block_until_ready(
        transition_layer(x5, *args5[1:], ew_dtype=jnp.bfloat16))
    assert out5.shape == (N, C_out, L // 2)
    assert jnp.allclose(out5, ref5, atol=5e-2, rtol=5e-2)

    print("KERNEL_OK")
</pallas_src>

<mosaic_0001>
module attributes {stable_mosaic.version = 11 : i64} {
  func.func @kernel(%arg0: i32, %arg1: i32, %arg2: memref<1x4x16xf32, #tpu.memory_space<vmem>>, %arg3: memref<4x1xf32, #tpu.memory_space<vmem>>, %arg4: memref<4x1xf32, #tpu.memory_space<vmem>>, %arg5: memref<8x4xf32, #tpu.memory_space<vmem>>, %arg6: memref<16x8xf32, #tpu.memory_space<vmem>>, %arg7: memref<8x1xf32, #tpu.memory_space<vmem>>, %arg8: memref<1x8x8xf32, #tpu.memory_space<vmem>>) attributes {dimension_semantics = [#tpu.dimension_semantics<parallel>, #tpu.dimension_semantics<parallel>], iteration_bounds = array<i64: 2, 1>, scalar_prefetch = 0 : i64, scratch_operands = 0 : i64, tpu.core_type = #tpu.core_type<tc>, window_params = [{transform_indices = @transform_0, window_bounds = array<i64: 1, 4, 16>}, {pipeline_mode = #tpu.pipeline_mode<synchronous>, transform_indices = @transform_1, window_bounds = array<i64: 4, 1>}, {pipeline_mode = #tpu.pipeline_mode<synchronous>, transform_indices = @transform_2, window_bounds = array<i64: 4, 1>}, {pipeline_mode = #tpu.pipeline_mode<synchronous>, transform_indices = @transform_3, window_bounds = array<i64: 8, 4>}, {pipeline_mode = #tpu.pipeline_mode<synchronous>, transform_indices = @transform_4, window_bounds = array<i64: 16, 8>}, {pipeline_mode = #tpu.pipeline_mode<synchronous>, transform_indices = @transform_5, window_bounds = array<i64: 8, 1>}, {transform_indices = @transform_6, window_bounds = array<i64: 1, 8, 8>}]} {
    %c0 = arith.constant 0 : index
    %c0_0 = arith.constant 0 : index
    %c0_1 = arith.constant 0 : index
    %0 = vector.load %arg2[%c0, %c0_0, %c0_1] : memref<1x4x16xf32, #tpu.memory_space<vmem>>, vector<1x4x16xf32>
    %1 = vector.shape_cast %0 : vector<1x4x16xf32> to vector<4x16xf32>
    %c0_2 = arith.constant 0 : index
    %c0_3 = arith.constant 0 : index
    %2 = vector.load %arg3[%c0_2, %c0_3] : memref<4x1xf32, #tpu.memory_space<vmem>>, vector<4x1xf32>
    %3 = vector.broadcast %2 : vector<4x1xf32> to vector<4x16xf32>
    %4 = arith.mulf %1, %3 : vector<4x16xf32>
    %c0_4 = arith.constant 0 : index
    %c0_5 = arith.constant 0 : index
    %5 = vector.load %arg4[%c0_4, %c0_5] : memref<4x1xf32, #tpu.memory_space<vmem>>, vector<4x1xf32>
    %6 = vector.broadcast %5 : vector<4x1xf32> to vector<4x16xf32>
    %7 = arith.addf %4, %6 : vector<4x16xf32>
    %cst = arith.constant 0.000000e+00 : f32
    %8 = vector.broadcast %cst : f32 to vector<4x16xf32>
    %9 = arith.maximumf %7, %8 : vector<4x16xf32>
    %c0_6 = arith.constant 0 : index
    %c0_7 = arith.constant 0 : index
    %10 = vector.load %arg6[%c0_6, %c0_7] : memref<16x8xf32, #tpu.memory_space<vmem>>, vector<16x8xf32>
    %cst_8 = arith.constant dense<0.000000e+00> : vector<4x8xf32>
    %11 = tpu.matmul %9, %10, %cst_8 {dimension_numbers = #tpu.dot_dimension_numbers<[1], [0], [0], [1], [0, 0, 1, 1], [], []>} : vector<4x16xf32>, vector<16x8xf32>, vector<4x8xf32> -> vector<4x8xf32>
    %c0_9 = arith.constant 0 : index
    %c0_10 = arith.constant 0 : index
    %12 = vector.load %arg5[%c0_9, %c0_10] : memref<8x4xf32, #tpu.memory_space<vmem>>, vector<8x4xf32>
    %cst_11 = arith.constant dense<0.000000e+00> : vector<8x8xf32>
    %13 = tpu.matmul %12, %11, %cst_11 {dimension_numbers = #tpu.dot_dimension_numbers<[1], [0], [0], [1], [0, 0, 1, 1], [], []>} : vector<8x4xf32>, vector<4x8xf32>, vector<8x8xf32> -> vector<8x8xf32>
    %c0_12 = arith.constant 0 : index
    %c0_13 = arith.constant 0 : index
    %14 = vector.load %arg7[%c0_12, %c0_13] : memref<8x1xf32, #tpu.memory_space<vmem>>, vector<8x1xf32>
    %15 = vector.broadcast %14 : vector<8x1xf32> to vector<8x8xf32>
    %16 = arith.addf %13, %15 : vector<8x8xf32>
    %c0_14 = arith.constant 0 : index
    %c0_15 = arith.constant 0 : index
    %c0_16 = arith.constant 0 : index
    %17 = vector.load %arg8[%c0_14, %c0_15, %c0_16] : memref<1x8x8xf32, #tpu.memory_space<vmem>>, vector<1x8x8xf32>
    %18 = vector.shape_cast %17 : vector<1x8x8xf32> to vector<8x8xf32>
    %19 = vector.shape_cast %16 : vector<8x8xf32> to vector<1x8x8xf32>
    tpu.vector_store %arg8[%c0_14, %c0_15, %c0_16], %19 {strides = array<i32>} : memref<1x8x8xf32, #tpu.memory_space<vmem>>, vector<1x8x8xf32>,
    return
  }
  func.func @transform_0(%arg0: i32, %arg1: i32) -> (i32, i32, i32) {
    %c0_i32 = arith.constant 0 : i32
    %c0_i32_0 = arith.constant 0 : i32
    return %arg0, %c0_i32, %arg1 : i32, i32, i32
  }
  func.func @transform_1(%arg0: i32, %arg1: i32) -> (i32, i32) {
    %c0_i32 = arith.constant 0 : i32
    %c0_i32_0 = arith.constant 0 : i32
    %c0_i32_1 = arith.constant 0 : i32
    return %c0_i32, %c0_i32_0 : i32, i32
  }
  func.func @transform_2(%arg0: i32, %arg1: i32) -> (i32, i32) {
    %c0_i32 = arith.constant 0 : i32
    %c0_i32_0 = arith.constant 0 : i32
    %c0_i32_1 = arith.constant 0 : i32
    return %c0_i32, %c0_i32_0 : i32, i32
  }
  func.func @transform_3(%arg0: i32, %arg1: i32) -> (i32, i32) {
    %c0_i32 = arith.constant 0 : i32
    %c0_i32_0 = arith.constant 0 : i32
    %c0_i32_1 = arith.constant 0 : i32
    return %c0_i32, %c0_i32_0 : i32, i32
  }
  func.func @transform_4(%arg0: i32, %arg1: i32) -> (i32, i32) {
    %c0_i32 = arith.constant 0 : i32
    %c0_i32_0 = arith.constant 0 : i32
    %c0_i32_1 = arith.constant 0 : i32
    return %c0_i32, %c0_i32_0 : i32, i32
  }
  func.func @transform_5(%arg0: i32, %arg1: i32) -> (i32, i32) {
    %c0_i32 = arith.constant 0 : i32
    %c0_i32_0 = arith.constant 0 : i32
    %c0_i32_1 = arith.constant 0 : i32
    return %c0_i32, %c0_i32_0 : i32, i32
  }
  func.func @transform_6(%arg0: i32, %arg1: i32) -> (i32, i32, i32) {
    %c0_i32 = arith.constant 0 : i32
    %c0_i32_0 = arith.constant 0 : i32
    return %arg0, %c0_i32, %arg1 : i32, i32, i32
  }
}

</mosaic_0001>

<bundles_post_ra>
// kernel: tpu_custom_call.1
= control target key start
LH: loop header
LB: loop body
LE: loop exit
PB: predicated region body
PF: predicated region fallthrough
CT: control target
= control target key end

     0   :  { %11 = vsyncpa [#allocation3], 0  ;;  %s882_s0 = inlined_call_operand.vmem [shape: f32[2,4,16], index: 0, kind: input, shape index: {}]   ;;  %s883_s1 = inlined_call_operand.vmem [shape: f32[4,1], index: 1, kind: input, shape index: {}]   ;;  %s884_s2 = inlined_call_operand.vmem [shape: f32[4,1], index: 2, kind: input, shape index: {}]   ;;  %s885_s3 = inlined_call_operand.vmem [shape: f32[8,4], index: 3, kind: input, shape index: {}]   ;;  %s886_s4 = inlined_call_operand.vmem [shape: f32[16,8], index: 4, kind: input, shape index: {}]   ;;  %s887_s5 = inlined_call_operand.vmem [shape: f32[8,1], index: 5, kind: input, shape index: {}]   ;;  %s888_s6 = inlined_call_operand.hbm [shape: f32[2,8,8], index: 6, kind: output, shape index: {}]  }
   0x1   :  { %13 = vsyncpa [#allocation3 + $0x1], 0  ;;  %s752_s21 = smov 0   ;;  %s754_s22 = smov 0  }
   0x2   :  { %s756_s23 = smov 0   ;;  %s758_s24 = smov 0  }
   0x3   :  { %s760_s25 = smov 0   ;;  %s762_s26 = smov 0  }
   0x4 LB: > { %s537_s27 = sadd.s32 4294967295, %s710_s26   ;;  %s538_s28 = sadd.s32 4294967294, %s710_s26   ;;  %s710_s26 = sphi %s762_s26, %s19_s26   ;;  %s706_s25 = sphi %s760_s25, %s895_s25   ;;  %s702_s24 = sphi %s758_s24, %s894_s24   ;;  %s698_s23 = sphi %s756_s23, %s893_s23   ;;  %s694_s22 = sphi %s754_s22, %s892_s22   ;;  %s690_s21 = sphi %s752_s21, %s891_s21  }
   0x5   : > { %s31_s29 = sadd.s32 1, %s706_s25  ;;  %s173_s30 = sadd.s32 1, %s698_s23 }
   0x6   : > { %p33_p0 = scmp.ge.s32.totalorder %s31_s29, 2  ;;  %p183_p1 = scmp.ne.s32.totalorder %s698_s23, %s694_s22 }
   0x7   : > { %p184_p2 = scmp.eq.s32.totalorder %s537_s27, 1  ;;  %p189_p3 = scmp.ne.s32.totalorder %s694_s22, %s690_s21 }
   0x8   : > { %s897_s29 = smov (%p33_p0, %s31_s29), 0  ;;  %p190_p5 = scmp.eq.s32.totalorder %s538_s28, 1 }
   0x9   : > { %p792_p4 = por %p184_p2, %p183_p1  ;;  %s168_s8 = ssub.s32 %s706_s25, %s897_s29 }
   0xa   : > { %p541_p6 = scmp.ge.s32.totalorder %s710_s26, 1  ;;  %p171_p7 = scmp.eq.s32.totalorder %s168_s8, 0 }
   0xb   : > { %p799_p8 = por %p190_p5, %p189_p3  ;;  %p233_p9 = scmp.lt.s32.totalorder %s710_s26, 3 }
   0xc   : > { %s805_s10 = scalar_select %p171_p7, %s698_s23, %s173_s30  }
   0xd   : > { %p234_p10 = pnand %p541_p6, %p233_p9 }
   0xe   : > { %v273_v0 = vld [vmem:[%s883_s1] sm:$0xf] (!%p234_p10)  ;;  %v712_v1 = vmov (!%p234_p10), 0   ;;  %v289_v4 = vld [vmem:[%s886_s4 + $0x8] sm:$0xff] (!%p234_p10)  ;;  %v713_v6 = vmov (!%p234_p10), 0.0|0.0   ;;  %vm714_vm0 = vmmov (!%p234_p10), 0  }
   0xf   : > { %237 = sbr.rel (%p234_p10) target bundleno = 593 (0x251), region = 44  ;;  %630 = vset.pattern.permute.xlu0 (!%p234_p10), %v712_v1  ;;  %631 = vset.pattern.permute.xlu1 (!%p234_p10), %v712_v1  ;;  %v280_v2 = vld [vmem:[%s884_s2] sm:$0xf] (!%p234_p10)  ;;  %v715_v7 = vmov (!%p234_p10), 0.0   ;;  %p265_p11 = scmp.lt.s32.totalorder (!%p234_p10), %s702_s24, 1  ;;  %vm290_vm1 = vcmask (!%p234_p10), 130048  }
  0x10   : > { %276 = vperm.xlu0 (!%p234_p10), %630, %v273_v0   ;;  %v288_v3 = vld [vmem:[%s886_s4] sm:$0xff] (!%p234_p10)  ;;  %568 = vmatprep.subr.bf16.mxu0 (!%p234_p10), %v713_v6  ;;  %vm375_vm2 = vcmask (!%p234_p10), 1043456   ;;  %vm371_vm3 = vcmask (!%p234_p10), 31744   ;;  %s262_s14 = sand.u32 (!%p234_p10), 1, %s694_s22   ;;  %s548_s16 = sshll.u32 (!%p234_p10), %s702_s24, 7  ;;  %vm449_vm4 = vcmask (!%p234_p10), 64512  }
  0x11   : > { %v569_v5 = vpack.c.bf16 (!%p234_p10), %v289_v4, %v288_v3  ;;  %560 = vmatprep.mubr.msk.f32.mxu0 (!%p234_p10), %vm714_vm0, %v715_v7  ;;  %563 = vmatprep.subr.mxu1 (!%p234_p10), %v715_v7  ;;  %v365_v14 = vld [vmem:[%s887_s5] sm:$0xff] (!%p234_p10)  ;;  %s542_s15 = sshll.u32 (!%p234_p10), %s262_s14, 3  ;;  %s835_s27 = scalar_lea.hbm (!%p234_p10), %s888_s6, %s548_s16 }
  0x12   : > { %565 = vmatprep.mubr.msk.f32.mxu1 (!%p234_p10), %vm714_vm0, %v715_v7  ;;  %368 = vperm.xlu1 (!%p234_p10), %631, %v365_v14   ;;  %v364_v15 = vld [vmem:[%s885_s3] sm:$0xff] (!%p234_p10)  ;;  %s264_s17 = scalar_lea.vmem (!%p234_p10), [#allocation2], %s542_s15  ;;  %s452_s28 = scalar_lea.sflag (!%p234_p10), [#allocation3], %s262_s14 }
  0x13   : > { %570 = vmatpush3.bf16.msra.mxu0 (!%p234_p10), %v569_v5  ;;  %s466_s18 = sshll.u32 (!%p234_p10), %s264_s17, 4  ;;  %s837_s18 = int_to_ptr.vmem [resolvable:$true] %s466_s18 }
  0x14   : > { %283 = vperm.xlu0 (!%p234_p10), %630, %v280_v2  }
  0x16   : > { %s266_s19 = scalar_select %p265_p11, %s702_s24, 1 }
  0x17   : > { %s716_s24 = smov [#allocation2]  }
  0x18   : > { %s543_s20 = sshll.u32 %s266_s19, 2  ;;  %s636_s8 = sshll.u32 %s716_s24, 4  ;;  %s637_s8 = int_to_ptr.vmem [resolvable:$false] %s636_s8 }
  0x19   : > { %s271_s30 = scalar_lea.vmem %s882_s0, %s543_s20  ;;  %s638_s11 = scalar_lea.vmem %s637_s8, 256 }
  0x1a   : > { %v272_v9 = vld [vmem:[%s271_s30] sm:$0xf]  ;;  %s632_s30 = scalar_lea.vmem %s837_s18, 128  ;;  %p639_p1 = scmp.lt.s32.totalorder %s837_s18, %s637_s8 }
  0x1b   : > { %p633_p12 = scmp.ne.s32.totalorder %s837_s18, %s632_s30  ;;  %p640_p2 = scmp.lt.s32.totalorder %s638_s11, %s632_s30 }
  0x1d   : > { %p634_p13 = pnand %p633_p12, %p792_p4  ;;  %p641_p3 = por %p640_p2, %p639_p1 }
  0x1f   : > { %p635_p0 = pneg %p634_p13 }
  0x21   : > { %p642_p5 = pnand %p641_p3, %p635_p0 }
  0x8f   : > { %v277_v8 = vpop.permute.xlu0 %276 }
  0x90   : > { %v279_v10 = vmul.f32 %v277_v8, %v272_v9 }
  0x91   : > { %v369_v18 = vpop.permute.xlu1 %368 }
  0x93   : > { %v284_v11 = vpop.permute.xlu0 %283 }
  0x94   : > { %v286_v12 = vadd.f32 %v284_v11, %v279_v10 }
  0x96   : > { %v287_v13 = vmax.f32 %v286_v12, 0.0 }
  0x98   : > { %561 = vmatmul.mubr.msk.f32.vlgmr.msra.gmra.mrb[0].mxu0 %vm290_vm1, %v287_v13 }
 0x16b   : > { %v360_v16 = vpop.f32.mrb[0].mxu0 }
 0x16c   : > { %v562_v17 = vpop.f32.mrb[1].mxu0  ;;  %564 = vmatpush3.msk.msra.mxu1 %vm375_vm2, %v360_v16 }
 0x16d   : > { %566 = vmatmul.mubr.msk.f32.vlgmr.msra.gmra.mrb[0].mxu1 %vm371_vm3, %v364_v15 }
 0x240   : > { %v445_v19 = vpop.f32.mrb[0].mxu1 }
 0x241   : > { %v446_v20 = vadd.f32 %v445_v19, %v369_v18  ;;  %v567_v21 = vpop.f32.mrb[1].mxu1 }
 0x243   : > { %450 = vst.msk [vmem:[%s264_s17] sm:$0xff] %vm449_vm4, %v446_v20 }
 0x244   : > { %645 = shalt.err (!%p642_p5)
}
 0x245   : > { %s646_s12 = scalar_lea.hbm %s835_s27, 128  ;;  %s650_s15 = scalar_lea.hbm %s888_s6, 256 }
 0x246   : > { %p647_p6 = scmp.ne.s32.totalorder %s835_s27, %s646_s12  ;;  %p651_p10 = scmp.lt.u32.totalorder %s835_s27, %s888_s6 }
 0x247   : > { %p652_p11 = scmp.lt.u32.totalorder %s650_s15, %s646_s12  ;;  %p654_p13 = scmp.lt.u32.totalorder %s646_s12, %s835_s27 }
 0x248   : > { %p648_p7 = pnand %p647_p6, %p792_p4 }
 0x249   : > { %p653_p12 = por %p652_p11, %p651_p10 }
 0x24a   : > { %p649_p9 = pneg %p648_p7 }
 0x24b   : > { %p655_p0 = por %p654_p13, %p653_p12 }
 0x24d   : > { %p656_p1 = pnand %p655_p0, %p649_p9 }
 0x24f   : > { %659 = shalt.err (!%p656_p1)
}
 0x250   : > { %571 = dma.vmem_to_hbm [thread:$0]  (%p792_p4), %s837_s18, 128, %s835_s27, %s452_s28  }
 0x251 PF: > { %p577_p2 = scmp.ge.s32.totalorder %s710_s26, 2  ;;  %s478_s19 = sand.u32 1, %s690_s21  }
 0x252   : > { %s479_s20 = scalar_lea.sflag [#allocation3], %s478_s19 }
 0x253   : > { %p574_p3 = pnand %p577_p2, %p799_p8 }
 0x255   : > { %685 = dma.done.wait (!%p574_p3), %s479_s20, 128  }
 0x256   : > { %687 = vsyncadd (!%p574_p3), %s479_s20, 4294967168  ;;  %s19_s26 = sadd.s32 1, %s710_s26   ;;  %s891_s21 = smov %s694_s22 }
 0x257   : > { %p16_p5 = scmp.ge.s32.totalorder %s19_s26, 4   ;;  %s892_s22 = smov %s698_s23 }
 0x258   : > { %s893_s23 = smov %s805_s10  ;;  %s894_s24 = smov %s706_s25 }
 0x259   : > { %s895_s25 = smov %s897_s29  ;;  %18 = sbr.rel (!%p16_p5) target bundleno = 4 (0x4), region = 79 }
 0x260   :  { %484 = vsyncpa [#allocation3], 1 }
 0x261   :  { %486 = vsyncpa [#allocation3 + $0x1], 1 }

</bundles_post_ra>
